<compile_context>
chip_gen: v7x
topology: tpu7x:2x2x1
jax: 0.10.0
libtpu: 0.0.40
codegen_flags: <defaults>
</compile_context>

<pallas_src>
import numpy as np
import jax
import jax.numpy as jnp
from jax.experimental import pallas as pl
from jax.experimental.pallas import tpu as pltpu


# ----------------------------------------------------------------------------
# Static index-structure helpers (numpy, trace-time only)
# ----------------------------------------------------------------------------
def _pool_starts(in_size, out_size, sample=0.5, pool_size=2):
    """PyTorch FractionalMaxPool2d interval starts with a fixed random sample."""
    # TODO(synk): PyTorch draws fresh _random_samples per forward; we fix
    # u = 0.5 (equivalent to passing _random_samples=0.5) for determinism.
    starts = np.zeros((out_size,), dtype=np.int64)
    if out_size > 1:
        alpha = float(in_size - pool_size) / float(out_size - 1)
        for i in range(out_size - 1):
            starts[i] = int((i + sample) * alpha) - int(sample * alpha)
    starts[out_size - 1] = in_size - pool_size
    return starts


def _nearest_idx(out_size, in_size):
    """nn.Upsample(mode='nearest'): src = floor(dst * in / out)."""
    return np.minimum((np.arange(out_size) * in_size) // out_size, in_size - 1)


def _merge_factor(h, lane):
    """Smallest m with h % m == 0 and (m*lane) % 128 == 0 (lane-dense slab)."""
    for m in range(1, h + 1):
        if h % m == 0 and (m * lane) % 128 == 0:
            return m
    return 1


# ----------------------------------------------------------------------------
# Parameter preparation: fold pooling / conv taps / upsampling into matrices
# ----------------------------------------------------------------------------
def init_pyramid_params(key, D, cardinality):
    params = []
    for _ in range(cardinality):
        key, kw, kb = jax.random.split(key, 3)
        w = jax.random.normal(kw, (D, D, 3, 3), jnp.float32) * 0.1  # (co,ci,kh,kw)
        b = jax.random.normal(kb, (D,), jnp.float32) * 0.1
        params.append({"w": w, "b": b})
    return params


def fold_pyramid_params(params, C, cardinality, input_res):
    """Per branch, build:
         shp  : (ph+2, H-1)        fractional-pool row selection + conv pad ring
         hmat : (3, (W-1)*C, W*C)  col-pool-select + 3x3 conv (kw,ci folded) +
                                   col-upsample, one band matrix per kh
         uhg  : (m, H/m, ph)       row-upsample split into m interleaved groups
         brow : (1, m*W*C)         conv bias broadcast row
       Exact algebra (0/1 selection matrices); done once, like BN folding.
    """
    H = W = input_res
    scale = 2.0 ** (-1.0 / cardinality)
    m = _merge_factor(H, W * C)
    folded = []
    for card in range(cardinality):
        ratio = scale ** (card + 1)
        ph = max(int(H * ratio), 1)
        pw = max(int(W * ratio), 1)
        sh = _pool_starts(H, ph)
        sw = _pool_starts(W, pw)

        # Padded 0/1 selection matrices (zero rows == the conv's zero padding).
        shp = np.zeros((ph + 2, H - 1), np.float32)
        shp[np.arange(1, ph + 1), sh] = 1.0
        swp = np.zeros((pw + 2, W - 1), np.float32)
        swp[np.arange(1, pw + 1), sw] = 1.0
        uh = np.zeros((H, ph), np.float32)
        uh[np.arange(H), _nearest_idx(H, ph)] = 1.0
        uw = np.zeros((W, pw), np.float32)
        uw[np.arange(W), _nearest_idx(W, pw)] = 1.0

        # A[kw, w, j] = sum_q Uw[j, q] * Swp[q + kw, w]
        a = np.stack([swp[kw:kw + pw, :].T @ uw.T for kw in range(3)], axis=0)

        # hmat[kh, w*C+ci, j*C+co] = sum_kw A[kw, w, j] * W[co, ci, kh, kw]
        w_pt = params[card]["w"]
        hmat = jnp.einsum("kwj,oihk->hwijo", jnp.asarray(a), w_pt)
        hmat = hmat.reshape(3, (W - 1) * C, W * C)

        brow = jnp.tile(params[card]["b"], m * W)[None, :]          # (1, m*W*C)
        uhg = jnp.asarray(np.stack([uh[g::m, :] for g in range(m)], axis=0))

        folded.append({"shp": jnp.asarray(shp), "hmat": hmat,
                       "uhg": uhg, "brow": brow})
    return folded


# ----------------------------------------------------------------------------
# The fused Pallas kernel
# ----------------------------------------------------------------------------
def _make_pyramid_kernel(C, H, W, m, branch_ph):
    lanes = W * C

    def kernel(*refs):
        x_ref = refs[0]
        out_ref = refs[-1]
        branch_refs = refs[1:-1]

        x = x_ref[0]                                      # (H, W*C) NHWC-flat
        # Dense stride-1 2x2 max map, shared by every branch (VPU only).
        rmax = jnp.maximum(x[:-1, :], x[1:, :])           # (H-1, W*C)
        cm = jnp.maximum(rmax[:, :-C], rmax[:, C:])       # (H-1, (W-1)*C)

        # Single lane-dense accumulator: one full (8,128) f32 vreg at demo size.
        acc = jnp.zeros((H // m, m * lanes), jnp.float32)

        for card, ph in enumerate(branch_ph):             # static unroll
            shp_ref, h_ref, uhg_ref, brow_ref = branch_refs[4 * card:4 * card + 4]

            # Fractional-pool row selection (+ zero-pad ring rows) -> MXU.
            y = jnp.dot(shp_ref[...], cm,
                        preferred_element_type=jnp.float32)        # (ph+2, (W-1)*C)

            # 3x3 conv + col-pool-select + col-upsample: three matmuls, slicing
            # only along the sublane axis; kw/ci taps live inside h_ref[kh].
            z = jnp.dot(y[0:ph, :], h_ref[0],
                        preferred_element_type=jnp.float32)         # (ph, W*C)
            for kh in range(1, 3):
                z = z + jnp.dot(y[kh:kh + ph, :], h_ref[kh],
                                preferred_element_type=jnp.float32)

            # Row upsample, emitted directly in the (H/m, m*W*C) slab layout so
            # the accumulator and the final store stay lane-dense/unmasked.
            pieces = [jnp.dot(uhg_ref[g], z, preferred_element_type=jnp.float32)
                      for g in range(m)]
            up = pieces[0] if m == 1 else jnp.concatenate(pieces, axis=-1)
            acc = acc + up + brow_ref[...]

        out_ref[0] = acc.astype(out_ref.dtype)

    return kernel


def pyramid_forward(x_nchw, folded):
    """x_nchw: (N, C, H, W) -> Pyramid output, same shape (NCHW)."""
    N, C, H, W = x_nchw.shape
    lanes = W * C
    branch_ph = tuple(int(f["shp"].shape[0]) - 2 for f in folded)
    m = folded[0]["brow"].shape[1] // lanes
    rows = H // m

    # NCHW -> lane-dense NHWC slab (wrapper-side layout plumbing, one tiny op).
    x_in = jnp.transpose(x_nchw, (0, 2, 3, 1)).reshape(N, H, lanes)
    x_in = x_in.astype(jnp.float32)

    def _const_map(ndim):
        return lambda n: (0,) * ndim

    in_specs = [pl.BlockSpec((1, H, lanes), lambda n: (n, 0, 0))]
    inputs = [x_in]
    for f in folded:
        for name in ("shp", "hmat", "uhg", "brow"):
            a = f[name]
            inputs.append(a)
            in_specs.append(pl.BlockSpec(a.shape, _const_map(a.ndim)))

    # Advisory cost estimate so XLA schedules surrounding ops around the call.
    flops = 0
    for ph in branch_ph:
        flops += 2 * (ph + 2) * (H - 1) * (W - 1) * C        # pool row-select
        flops += 2 * 3 * ph * (W - 1) * C * lanes             # conv band matmuls
        flops += 2 * H * ph * lanes                           # row upsample
    flops *= N
    bytes_accessed = sum(int(np.prod(a.shape)) * 4 for a in inputs)
    bytes_accessed += N * rows * m * lanes * 4

    out_slab = pl.pallas_call(
        _make_pyramid_kernel(C, H, W, m, branch_ph),
        out_shape=jax.ShapeDtypeStruct((N, rows, m * lanes), jnp.float32),
        grid=(N,),
        in_specs=in_specs,
        out_specs=pl.BlockSpec((1, rows, m * lanes), lambda n: (n, 0, 0)),
        compiler_params=pltpu.CompilerParams(
            dimension_semantics=("parallel",)),
        cost_estimate=pl.CostEstimate(flops=int(flops), transcendentals=0,
                                      bytes_accessed=int(bytes_accessed)),
    )(*inputs)

    # Slab -> NHWC (free reshape) -> NCHW (one tiny wrapper-side transpose).
    return jnp.transpose(out_slab.reshape(N, H, W, C), (0, 3, 1, 2))


# ----------------------------------------------------------------------------
# Demo
# ----------------------------------------------------------------------------
if __name__ == "__main__":
    D = 4
    cardinality = 3
    input_res = 16
    batch = 2

    key = jax.random.PRNGKey(0)
    key, kx = jax.random.split(key)
    x = jax.random.normal(kx, (batch, D, input_res, input_res), jnp.float32)

    params = init_pyramid_params(key, D, cardinality)
    folded = fold_pyramid_params(params, D, cardinality, input_res)

    fwd = jax.jit(pyramid_forward)
    out = jax.block_until_ready(fwd(x, folded))

    assert out.shape == x.shape, (out.shape, x.shape)
    assert out.dtype == jnp.float32
    assert bool(jnp.all(jnp.isfinite(out)))
    print("KERNEL_OK")
</pallas_src>

<mosaic_0001>
module attributes {stable_mosaic.version = 11 : i64} {
  func.func @kernel(%arg0: i32, %arg1: memref<1x16x64xf32, #tpu.memory_space<vmem>>, %arg2: memref<14x15xf32, #tpu.memory_space<vmem>>, %arg3: memref<3x60x64xf32, #tpu.memory_space<vmem>>, %arg4: memref<2x8x12xf32, #tpu.memory_space<vmem>>, %arg5: memref<1x128xf32, #tpu.memory_space<vmem>>, %arg6: memref<12x15xf32, #tpu.memory_space<vmem>>, %arg7: memref<3x60x64xf32, #tpu.memory_space<vmem>>, %arg8: memref<2x8x10xf32, #tpu.memory_space<vmem>>, %arg9: memref<1x128xf32, #tpu.memory_space<vmem>>, %arg10: memref<10x15xf32, #tpu.memory_space<vmem>>, %arg11: memref<3x60x64xf32, #tpu.memory_space<vmem>>, %arg12: memref<2x8x8xf32, #tpu.memory_space<vmem>>, %arg13: memref<1x128xf32, #tpu.memory_space<vmem>>, %arg14: memref<1x8x128xf32, #tpu.memory_space<vmem>>) attributes {dimension_semantics = [#tpu.dimension_semantics<parallel>], iteration_bounds = array<i64: 2>, scalar_prefetch = 0 : i64, scratch_operands = 0 : i64, tpu.core_type = #tpu.core_type<tc>, window_params = [{transform_indices = @transform_0, window_bounds = array<i64: 1, 16, 64>}, {pipeline_mode = #tpu.pipeline_mode<synchronous>, transform_indices = @transform_1, window_bounds = array<i64: 14, 15>}, {pipeline_mode = #tpu.pipeline_mode<synchronous>, transform_indices = @transform_2, window_bounds = array<i64: 3, 60, 64>}, {pipeline_mode = #tpu.pipeline_mode<synchronous>, transform_indices = @transform_3, window_bounds = array<i64: 2, 8, 12>}, {pipeline_mode = #tpu.pipeline_mode<synchronous>, transform_indices = @transform_4, window_bounds = array<i64: 1, 128>}, {pipeline_mode = #tpu.pipeline_mode<synchronous>, transform_indices = @transform_5, window_bounds = array<i64: 12, 15>}, {pipeline_mode = #tpu.pipeline_mode<synchronous>, transform_indices = @transform_6, window_bounds = array<i64: 3, 60, 64>}, {pipeline_mode = #tpu.pipeline_mode<synchronous>, transform_indices = @transform_7, window_bounds = array<i64: 2, 8, 10>}, {pipeline_mode = #tpu.pipeline_mode<synchronous>, transform_indices = @transform_8, window_bounds = array<i64: 1, 128>}, {pipeline_mode = #tpu.pipeline_mode<synchronous>, transform_indices = @transform_9, window_bounds = array<i64: 10, 15>}, {pipeline_mode = #tpu.pipeline_mode<synchronous>, transform_indices = @transform_10, window_bounds = array<i64: 3, 60, 64>}, {pipeline_mode = #tpu.pipeline_mode<synchronous>, transform_indices = @transform_11, window_bounds = array<i64: 2, 8, 8>}, {pipeline_mode = #tpu.pipeline_mode<synchronous>, transform_indices = @transform_12, window_bounds = array<i64: 1, 128>}, {transform_indices = @transform_13, window_bounds = array<i64: 1, 8, 128>}]} {
    %c0 = arith.constant 0 : index
    %c0_0 = arith.constant 0 : index
    %c0_1 = arith.constant 0 : index
    %0 = vector.load %arg1[%c0, %c0_0, %c0_1] : memref<1x16x64xf32, #tpu.memory_space<vmem>>, vector<1x16x64xf32>
    %1 = vector.shape_cast %0 : vector<1x16x64xf32> to vector<16x64xf32>
    %2 = vector.extract_strided_slice %1 {offsets = [0, 0], sizes = [15, 64], strides = [1, 1]} : vector<16x64xf32> to vector<15x64xf32>
    %3 = vector.extract_strided_slice %1 {offsets = [1, 0], sizes = [15, 64], strides = [1, 1]} : vector<16x64xf32> to vector<15x64xf32>
    %4 = arith.maximumf %2, %3 : vector<15x64xf32>
    %5 = vector.extract_strided_slice %4 {offsets = [0, 0], sizes = [15, 60], strides = [1, 1]} : vector<15x64xf32> to vector<15x60xf32>
    %6 = vector.extract_strided_slice %4 {offsets = [0, 4], sizes = [15, 60], strides = [1, 1]} : vector<15x64xf32> to vector<15x60xf32>
    %7 = arith.maximumf %5, %6 : vector<15x60xf32>
    %cst = arith.constant 0.000000e+00 : f32
    %8 = vector.broadcast %cst : f32 to vector<8x128xf32>
    %c0_2 = arith.constant 0 : index
    %c0_3 = arith.constant 0 : index
    %9 = vector.load %arg2[%c0_2, %c0_3] : memref<14x15xf32, #tpu.memory_space<vmem>>, vector<14x15xf32>
    %cst_4 = arith.constant dense<0.000000e+00> : vector<14x60xf32>
    %10 = tpu.matmul %9, %7, %cst_4 {dimension_numbers = #tpu.dot_dimension_numbers<[1], [0], [0], [1], [0, 0, 1, 1], [], []>} : vector<14x15xf32>, vector<15x60xf32>, vector<14x60xf32> -> vector<14x60xf32>
    %11 = vector.extract_strided_slice %10 {offsets = [0, 0], sizes = [12, 60], strides = [1, 1]} : vector<14x60xf32> to vector<12x60xf32>
    %c0_5 = arith.constant 0 : index
    %c0_6 = arith.constant 0 : index
    %c0_7 = arith.constant 0 : index
    %12 = vector.load %arg3[%c0_5, %c0_6, %c0_7] : memref<3x60x64xf32, #tpu.memory_space<vmem>>, vector<1x60x64xf32>
    %13 = vector.shape_cast %12 : vector<1x60x64xf32> to vector<60x64xf32>
    %cst_8 = arith.constant dense<0.000000e+00> : vector<12x64xf32>
    %14 = tpu.matmul %11, %13, %cst_8 {dimension_numbers = #tpu.dot_dimension_numbers<[1], [0], [0], [1], [0, 0, 1, 1], [], []>} : vector<12x60xf32>, vector<60x64xf32>, vector<12x64xf32> -> vector<12x64xf32>
    %15 = vector.extract_strided_slice %10 {offsets = [1, 0], sizes = [12, 60], strides = [1, 1]} : vector<14x60xf32> to vector<12x60xf32>
    %c1 = arith.constant 1 : index
    %c0_9 = arith.constant 0 : index
    %c0_10 = arith.constant 0 : index
    %16 = vector.load %arg3[%c1, %c0_9, %c0_10] : memref<3x60x64xf32, #tpu.memory_space<vmem>>, vector<1x60x64xf32>
    %17 = vector.shape_cast %16 : vector<1x60x64xf32> to vector<60x64xf32>
    %cst_11 = arith.constant dense<0.000000e+00> : vector<12x64xf32>
    %18 = tpu.matmul %15, %17, %cst_11 {dimension_numbers = #tpu.dot_dimension_numbers<[1], [0], [0], [1], [0, 0, 1, 1], [], []>} : vector<12x60xf32>, vector<60x64xf32>, vector<12x64xf32> -> vector<12x64xf32>
    %19 = arith.addf %14, %18 : vector<12x64xf32>
    %20 = vector.extract_strided_slice %10 {offsets = [2, 0], sizes = [12, 60], strides = [1, 1]} : vector<14x60xf32> to vector<12x60xf32>
    %c2 = arith.constant 2 : index
    %c0_12 = arith.constant 0 : index
    %c0_13 = arith.constant 0 : index
    %21 = vector.load %arg3[%c2, %c0_12, %c0_13] : memref<3x60x64xf32, #tpu.memory_space<vmem>>, vector<1x60x64xf32>
    %22 = vector.shape_cast %21 : vector<1x60x64xf32> to vector<60x64xf32>
    %cst_14 = arith.constant dense<0.000000e+00> : vector<12x64xf32>
    %23 = tpu.matmul %20, %22, %cst_14 {dimension_numbers = #tpu.dot_dimension_numbers<[1], [0], [0], [1], [0, 0, 1, 1], [], []>} : vector<12x60xf32>, vector<60x64xf32>, vector<12x64xf32> -> vector<12x64xf32>
    %24 = arith.addf %19, %23 : vector<12x64xf32>
    %c0_15 = arith.constant 0 : index
    %c0_16 = arith.constant 0 : index
    %c0_17 = arith.constant 0 : index
    %25 = vector.load %arg4[%c0_15, %c0_16, %c0_17] : memref<2x8x12xf32, #tpu.memory_space<vmem>>, vector<1x8x12xf32>
    %26 = vector.shape_cast %25 : vector<1x8x12xf32> to vector<8x12xf32>
    %cst_18 = arith.constant dense<0.000000e+00> : vector<8x64xf32>
    %27 = tpu.matmul %26, %24, %cst_18 {dimension_numbers = #tpu.dot_dimension_numbers<[1], [0], [0], [1], [0, 0, 1, 1], [], []>} : vector<8x12xf32>, vector<12x64xf32>, vector<8x64xf32> -> vector<8x64xf32>
    %c1_19 = arith.constant 1 : index
    %c0_20 = arith.constant 0 : index
    %c0_21 = arith.constant 0 : index
    %28 = vector.load %arg4[%c1_19, %c0_20, %c0_21] : memref<2x8x12xf32, #tpu.memory_space<vmem>>, vector<1x8x12xf32>
    %29 = vector.shape_cast %28 : vector<1x8x12xf32> to vector<8x12xf32>
    %cst_22 = arith.constant dense<0.000000e+00> : vector<8x64xf32>
    %30 = tpu.matmul %29, %24, %cst_22 {dimension_numbers = #tpu.dot_dimension_numbers<[1], [0], [0], [1], [0, 0, 1, 1], [], []>} : vector<8x12xf32>, vector<12x64xf32>, vector<8x64xf32> -> vector<8x64xf32>
    %31 = tpu.concatenate %27, %30 in 1 : vector<8x64xf32>, vector<8x64xf32> -> vector<8x128xf32>
    %32 = arith.addf %8, %31 : vector<8x128xf32>
    %c0_23 = arith.constant 0 : index
    %c0_24 = arith.constant 0 : index
    %33 = vector.load %arg5[%c0_23, %c0_24] : memref<1x128xf32, #tpu.memory_space<vmem>>, vector<1x128xf32>
    %34 = vector.broadcast %33 : vector<1x128xf32> to vector<8x128xf32>
    %35 = arith.addf %32, %34 : vector<8x128xf32>
    %c0_25 = arith.constant 0 : index
    %c0_26 = arith.constant 0 : index
    %36 = vector.load %arg6[%c0_25, %c0_26] : memref<12x15xf32, #tpu.memory_space<vmem>>, vector<12x15xf32>
    %cst_27 = arith.constant dense<0.000000e+00> : vector<12x60xf32>
    %37 = tpu.matmul %36, %7, %cst_27 {dimension_numbers = #tpu.dot_dimension_numbers<[1], [0], [0], [1], [0, 0, 1, 1], [], []>} : vector<12x15xf32>, vector<15x60xf32>, vector<12x60xf32> -> vector<12x60xf32>
    %38 = vector.extract_strided_slice %37 {offsets = [0, 0], sizes = [10, 60], strides = [1, 1]} : vector<12x60xf32> to vector<10x60xf32>
    %c0_28 = arith.constant 0 : index
    %c0_29 = arith.constant 0 : index
    %c0_30 = arith.constant 0 : index
    %39 = vector.load %arg7[%c0_28, %c0_29, %c0_30] : memref<3x60x64xf32, #tpu.memory_space<vmem>>, vector<1x60x64xf32>
    %40 = vector.shape_cast %39 : vector<1x60x64xf32> to vector<60x64xf32>
    %cst_31 = arith.constant dense<0.000000e+00> : vector<10x64xf32>
    %41 = tpu.matmul %38, %40, %cst_31 {dimension_numbers = #tpu.dot_dimension_numbers<[1], [0], [0], [1], [0, 0, 1, 1], [], []>} : vector<10x60xf32>, vector<60x64xf32>, vector<10x64xf32> -> vector<10x64xf32>
    %42 = vector.extract_strided_slice %37 {offsets = [1, 0], sizes = [10, 60], strides = [1, 1]} : vector<12x60xf32> to vector<10x60xf32>
    %c1_32 = arith.constant 1 : index
    %c0_33 = arith.constant 0 : index
    %c0_34 = arith.constant 0 : index
    %43 = vector.load %arg7[%c1_32, %c0_33, %c0_34] : memref<3x60x64xf32, #tpu.memory_space<vmem>>, vector<1x60x64xf32>
    %44 = vector.shape_cast %43 : vector<1x60x64xf32> to vector<60x64xf32>
    %cst_35 = arith.constant dense<0.000000e+00> : vector<10x64xf32>
    %45 = tpu.matmul %42, %44, %cst_35 {dimension_numbers = #tpu.dot_dimension_numbers<[1], [0], [0], [1], [0, 0, 1, 1], [], []>} : vector<10x60xf32>, vector<60x64xf32>, vector<10x64xf32> -> vector<10x64xf32>
    %46 = arith.addf %41, %45 : vector<10x64xf32>
    %47 = vector.extract_strided_slice %37 {offsets = [2, 0], sizes = [10, 60], strides = [1, 1]} : vector<12x60xf32> to vector<10x60xf32>
    %c2_36 = arith.constant 2 : index
    %c0_37 = arith.constant 0 : index
    %c0_38 = arith.constant 0 : index
    %48 = vector.load %arg7[%c2_36, %c0_37, %c0_38] : memref<3x60x64xf32, #tpu.memory_space<vmem>>, vector<1x60x64xf32>
    %49 = vector.shape_cast %48 : vector<1x60x64xf32> to vector<60x64xf32>
    %cst_39 = arith.constant dense<0.000000e+00> : vector<10x64xf32>
    %50 = tpu.matmul %47, %49, %cst_39 {dimension_numbers = #tpu.dot_dimension_numbers<[1], [0], [0], [1], [0, 0, 1, 1], [], []>} : vector<10x60xf32>, vector<60x64xf32>, vector<10x64xf32> -> vector<10x64xf32>
    %51 = arith.addf %46, %50 : vector<10x64xf32>
    %c0_40 = arith.constant 0 : index
    %c0_41 = arith.constant 0 : index
    %c0_42 = arith.constant 0 : index
    %52 = vector.load %arg8[%c0_40, %c0_41, %c0_42] : memref<2x8x10xf32, #tpu.memory_space<vmem>>, vector<1x8x10xf32>
    %53 = vector.shape_cast %52 : vector<1x8x10xf32> to vector<8x10xf32>
    %cst_43 = arith.constant dense<0.000000e+00> : vector<8x64xf32>
    %54 = tpu.matmul %53, %51, %cst_43 {dimension_numbers = #tpu.dot_dimension_numbers<[1], [0], [0], [1], [0, 0, 1, 1], [], []>} : vector<8x10xf32>, vector<10x64xf32>, vector<8x64xf32> -> vector<8x64xf32>
    %c1_44 = arith.constant 1 : index
    %c0_45 = arith.constant 0 : index
    %c0_46 = arith.constant 0 : index
    %55 = vector.load %arg8[%c1_44, %c0_45, %c0_46] : memref<2x8x10xf32, #tpu.memory_space<vmem>>, vector<1x8x10xf32>
    %56 = vector.shape_cast %55 : vector<1x8x10xf32> to vector<8x10xf32>
    %cst_47 = arith.constant dense<0.000000e+00> : vector<8x64xf32>
    %57 = tpu.matmul %56, %51, %cst_47 {dimension_numbers = #tpu.dot_dimension_numbers<[1], [0], [0], [1], [0, 0, 1, 1], [], []>} : vector<8x10xf32>, vector<10x64xf32>, vector<8x64xf32> -> vector<8x64xf32>
    %58 = tpu.concatenate %54, %57 in 1 : vector<8x64xf32>, vector<8x64xf32> -> vector<8x128xf32>
    %59 = arith.addf %35, %58 : vector<8x128xf32>
    %c0_48 = arith.constant 0 : index
    %c0_49 = arith.constant 0 : index
    %60 = vector.load %arg9[%c0_48, %c0_49] : memref<1x128xf32, #tpu.memory_space<vmem>>, vector<1x128xf32>
    %61 = vector.broadcast %60 : vector<1x128xf32> to vector<8x128xf32>
    %62 = arith.addf %59, %61 : vector<8x128xf32>
    %c0_50 = arith.constant 0 : index
    %c0_51 = arith.constant 0 : index
    %63 = vector.load %arg10[%c0_50, %c0_51] : memref<10x15xf32, #tpu.memory_space<vmem>>, vector<10x15xf32>
    %cst_52 = arith.constant dense<0.000000e+00> : vector<10x60xf32>
    %64 = tpu.matmul %63, %7, %cst_52 {dimension_numbers = #tpu.dot_dimension_numbers<[1], [0], [0], [1], [0, 0, 1, 1], [], []>} : vector<10x15xf32>, vector<15x60xf32>, vector<10x60xf32> -> vector<10x60xf32>
    %65 = vector.extract_strided_slice %64 {offsets = [0, 0], sizes = [8, 60], strides = [1, 1]} : vector<10x60xf32> to vector<8x60xf32>
    %c0_53 = arith.constant 0 : index
    %c0_54 = arith.constant 0 : index
    %c0_55 = arith.constant 0 : index
    %66 = vector.load %arg11[%c0_53, %c0_54, %c0_55] : memref<3x60x64xf32, #tpu.memory_space<vmem>>, vector<1x60x64xf32>
    %67 = vector.shape_cast %66 : vector<1x60x64xf32> to vector<60x64xf32>
    %cst_56 = arith.constant dense<0.000000e+00> : vector<8x64xf32>
    %68 = tpu.matmul %65, %67, %cst_56 {dimension_numbers = #tpu.dot_dimension_numbers<[1], [0], [0], [1], [0, 0, 1, 1], [], []>} : vector<8x60xf32>, vector<60x64xf32>, vector<8x64xf32> -> vector<8x64xf32>
    %69 = vector.extract_strided_slice %64 {offsets = [1, 0], sizes = [8, 60], strides = [1, 1]} : vector<10x60xf32> to vector<8x60xf32>
    %c1_57 = arith.constant 1 : index
    %c0_58 = arith.constant 0 : index
    %c0_59 = arith.constant 0 : index
    %70 = vector.load %arg11[%c1_57, %c0_58, %c0_59] : memref<3x60x64xf32, #tpu.memory_space<vmem>>, vector<1x60x64xf32>
    %71 = vector.shape_cast %70 : vector<1x60x64xf32> to vector<60x64xf32>
    %cst_60 = arith.constant dense<0.000000e+00> : vector<8x64xf32>
    %72 = tpu.matmul %69, %71, %cst_60 {dimension_numbers = #tpu.dot_dimension_numbers<[1], [0], [0], [1], [0, 0, 1, 1], [], []>} : vector<8x60xf32>, vector<60x64xf32>, vector<8x64xf32> -> vector<8x64xf32>
    %73 = arith.addf %68, %72 : vector<8x64xf32>
    %74 = vector.extract_strided_slice %64 {offsets = [2, 0], sizes = [8, 60], strides = [1, 1]} : vector<10x60xf32> to vector<8x60xf32>
    %c2_61 = arith.constant 2 : index
    %c0_62 = arith.constant 0 : index
    %c0_63 = arith.constant 0 : index
    %75 = vector.load %arg11[%c2_61, %c0_62, %c0_63] : memref<3x60x64xf32, #tpu.memory_space<vmem>>, vector<1x60x64xf32>
    %76 = vector.shape_cast %75 : vector<1x60x64xf32> to vector<60x64xf32>
    %cst_64 = arith.constant dense<0.000000e+00> : vector<8x64xf32>
    %77 = tpu.matmul %74, %76, %cst_64 {dimension_numbers = #tpu.dot_dimension_numbers<[1], [0], [0], [1], [0, 0, 1, 1], [], []>} : vector<8x60xf32>, vector<60x64xf32>, vector<8x64xf32> -> vector<8x64xf32>
    %78 = arith.addf %73, %77 : vector<8x64xf32>
    %c0_65 = arith.constant 0 : index
    %c0_66 = arith.constant 0 : index
    %c0_67 = arith.constant 0 : index
    %79 = vector.load %arg12[%c0_65, %c0_66, %c0_67] : memref<2x8x8xf32, #tpu.memory_space<vmem>>, vector<1x8x8xf32>
    %80 = vector.shape_cast %79 : vector<1x8x8xf32> to vector<8x8xf32>
    %cst_68 = arith.constant dense<0.000000e+00> : vector<8x64xf32>
    %81 = tpu.matmul %80, %78, %cst_68 {dimension_numbers = #tpu.dot_dimension_numbers<[1], [0], [0], [1], [0, 0, 1, 1], [], []>} : vector<8x8xf32>, vector<8x64xf32>, vector<8x64xf32> -> vector<8x64xf32>
    %c1_69 = arith.constant 1 : index
    %c0_70 = arith.constant 0 : index
    %c0_71 = arith.constant 0 : index
    %82 = vector.load %arg12[%c1_69, %c0_70, %c0_71] : memref<2x8x8xf32, #tpu.memory_space<vmem>>, vector<1x8x8xf32>
    %83 = vector.shape_cast %82 : vector<1x8x8xf32> to vector<8x8xf32>
    %cst_72 = arith.constant dense<0.000000e+00> : vector<8x64xf32>
    %84 = tpu.matmul %83, %78, %cst_72 {dimension_numbers = #tpu.dot_dimension_numbers<[1], [0], [0], [1], [0, 0, 1, 1], [], []>} : vector<8x8xf32>, vector<8x64xf32>, vector<8x64xf32> -> vector<8x64xf32>
    %85 = tpu.concatenate %81, %84 in 1 : vector<8x64xf32>, vector<8x64xf32> -> vector<8x128xf32>
    %86 = arith.addf %62, %85 : vector<8x128xf32>
    %c0_73 = arith.constant 0 : index
    %c0_74 = arith.constant 0 : index
    %87 = vector.load %arg13[%c0_73, %c0_74] : memref<1x128xf32, #tpu.memory_space<vmem>>, vector<1x128xf32>
    %88 = vector.broadcast %87 : vector<1x128xf32> to vector<8x128xf32>
    %89 = arith.addf %86, %88 : vector<8x128xf32>
    %c0_75 = arith.constant 0 : index
    %c0_76 = arith.constant 0 : index
    %c0_77 = arith.constant 0 : index
    %90 = vector.load %arg14[%c0_75, %c0_76, %c0_77] : memref<1x8x128xf32, #tpu.memory_space<vmem>>, vector<1x8x128xf32>
    %91 = vector.shape_cast %90 : vector<1x8x128xf32> to vector<8x128xf32>
    %92 = vector.shape_cast %89 : vector<8x128xf32> to vector<1x8x128xf32>
    tpu.vector_store %arg14[%c0_75, %c0_76, %c0_77], %92 {strides = array<i32>} : memref<1x8x128xf32, #tpu.memory_space<vmem>>, vector<1x8x128xf32>,
    return
  }
  func.func @transform_0(%arg0: i32) -> (i32, i32, i32) {
    %c0_i32 = arith.constant 0 : i32
    %c0_i32_0 = arith.constant 0 : i32
    %c0_i32_1 = arith.constant 0 : i32
    return %arg0, %c0_i32, %c0_i32_0 : i32, i32, i32
  }
  func.func @transform_1(%arg0: i32) -> (i32, i32) {
    %c0_i32 = arith.constant 0 : i32
    %c0_i32_0 = arith.constant 0 : i32
    %c0_i32_1 = arith.constant 0 : i32
    return %c0_i32, %c0_i32_0 : i32, i32
  }
  func.func @transform_2(%arg0: i32) -> (i32, i32, i32) {
    %c0_i32 = arith.constant 0 : i32
    %c0_i32_0 = arith.constant 0 : i32
    %c0_i32_1 = arith.constant 0 : i32
    %c0_i32_2 = arith.constant 0 : i32
    return %c0_i32, %c0_i32_0, %c0_i32_1 : i32, i32, i32
  }
  func.func @transform_3(%arg0: i32) -> (i32, i32, i32) {
    %c0_i32 = arith.constant 0 : i32
    %c0_i32_0 = arith.constant 0 : i32
    %c0_i32_1 = arith.constant 0 : i32
    %c0_i32_2 = arith.constant 0 : i32
    return %c0_i32, %c0_i32_0, %c0_i32_1 : i32, i32, i32
  }
  func.func @transform_4(%arg0: i32) -> (i32, i32) {
    %c0_i32 = arith.constant 0 : i32
    %c0_i32_0 = arith.constant 0 : i32
    %c0_i32_1 = arith.constant 0 : i32
    return %c0_i32, %c0_i32_0 : i32, i32
  }
  func.func @transform_5(%arg0: i32) -> (i32, i32) {
    %c0_i32 = arith.constant 0 : i32
    %c0_i32_0 = arith.constant 0 : i32
    %c0_i32_1 = arith.constant 0 : i32
    return %c0_i32, %c0_i32_0 : i32, i32
  }
  func.func @transform_6(%arg0: i32) -> (i32, i32, i32) {
    %c0_i32 = arith.constant 0 : i32
    %c0_i32_0 = arith.constant 0 : i32
    %c0_i32_1 = arith.constant 0 : i32
    %c0_i32_2 = arith.constant 0 : i32
    return %c0_i32, %c0_i32_0, %c0_i32_1 : i32, i32, i32
  }
  func.func @transform_7(%arg0: i32) -> (i32, i32, i32) {
    %c0_i32 = arith.constant 0 : i32
    %c0_i32_0 = arith.constant 0 : i32
    %c0_i32_1 = arith.constant 0 : i32
    %c0_i32_2 = arith.constant 0 : i32
    return %c0_i32, %c0_i32_0, %c0_i32_1 : i32, i32, i32
  }
  func.func @transform_8(%arg0: i32) -> (i32, i32) {
    %c0_i32 = arith.constant 0 : i32
    %c0_i32_0 = arith.constant 0 : i32
    %c0_i32_1 = arith.constant 0 : i32
    return %c0_i32, %c0_i32_0 : i32, i32
  }
  func.func @transform_9(%arg0: i32) -> (i32, i32) {
    %c0_i32 = arith.constant 0 : i32
    %c0_i32_0 = arith.constant 0 : i32
    %c0_i32_1 = arith.constant 0 : i32
    return %c0_i32, %c0_i32_0 : i32, i32
  }
  func.func @transform_10(%arg0: i32) -> (i32, i32, i32) {
    %c0_i32 = arith.constant 0 : i32
    %c0_i32_0 = arith.constant 0 : i32
    %c0_i32_1 = arith.constant 0 : i32
    %c0_i32_2 = arith.constant 0 : i32
    return %c0_i32, %c0_i32_0, %c0_i32_1 : i32, i32, i32
  }
  func.func @transform_11(%arg0: i32) -> (i32, i32, i32) {
    %c0_i32 = arith.constant 0 : i32
    %c0_i32_0 = arith.constant 0 : i32
    %c0_i32_1 = arith.constant 0 : i32
    %c0_i32_2 = arith.constant 0 : i32
    return %c0_i32, %c0_i32_0, %c0_i32_1 : i32, i32, i32
  }
  func.func @transform_12(%arg0: i32) -> (i32, i32) {
    %c0_i32 = arith.constant 0 : i32
    %c0_i32_0 = arith.constant 0 : i32
    %c0_i32_1 = arith.constant 0 : i32
    return %c0_i32, %c0_i32_0 : i32, i32
  }
  func.func @transform_13(%arg0: i32) -> (i32, i32, i32) {
    %c0_i32 = arith.constant 0 : i32
    %c0_i32_0 = arith.constant 0 : i32
    %c0_i32_1 = arith.constant 0 : i32
    return %arg0, %c0_i32, %c0_i32_0 : i32, i32, i32
  }
}

</mosaic_0001>

<bundles_post_ra>
// kernel: pyramid_forward.1
= control target key start
LH: loop header
LB: loop body
LE: loop exit
PB: predicated region body
PF: predicated region fallthrough
CT: control target
= control target key end

     0   :  { %s3584_s0 = inlined_call_operand.vmem [shape: f32[2,16,64], index: 0, kind: input, shape index: {}]   ;;  %s3585_s1 = inlined_call_operand.vmem [shape: f32[14,15], index: 1, kind: input, shape index: {}]   ;;  %s3586_s2 = inlined_call_operand.vmem [shape: f32[3,60,64], index: 2, kind: input, shape index: {}]   ;;  %s3587_s3 = inlined_call_operand.vmem [shape: f32[2,8,12], index: 3, kind: input, shape index: {}]   ;;  %s3588_s4 = inlined_call_operand.vmem [shape: f32[1,128], index: 4, kind: input, shape index: {}]   ;;  %s3589_s5 = inlined_call_operand.vmem [shape: f32[12,15], index: 5, kind: input, shape index: {}]   ;;  %s3590_s6 = inlined_call_operand.vmem [shape: f32[3,60,64], index: 6, kind: input, shape index: {}]   ;;  %s3591_s7 = inlined_call_operand.vmem [shape: f32[2,8,10], index: 7, kind: input, shape index: {}]   ;;  %s3592_s8 = inlined_call_operand.hbm [shape: f32[1,128], index: 8, kind: input, shape index: {}]   ;;  %s3593_s9 = inlined_call_operand.vmem [shape: f32[10,15], index: 9, kind: input, shape index: {}]   ;;  %s3594_s10 = inlined_call_operand.hbm [shape: f32[3,60,64], index: 10, kind: input, shape index: {}]   ;;  %s3595_s11 = inlined_call_operand.hbm [shape: f32[2,8,8], index: 11, kind: input, shape index: {}]   ;;  %s3596_s12 = inlined_call_operand.hbm [shape: f32[1,128], index: 12, kind: input, shape index: {}]   ;;  %s3597_s13 = inlined_call_operand.vmem [shape: f32[2,8,128], index: 13, kind: output, shape index: {}]  }
   0x1   :  { %3601 = sst [smem:[#allocation13_spill]] %s3588_s4 }
   0x2   :  { %3602 = sst [smem:[#allocation14_spill]] %s3597_s13 }
   0x3   :  { %18 = vsyncpa [#allocation3], 0 }
   0x4   :  { %19 = vsyncpa [#allocation5], 0 }
   0x5   :  { %20 = vsyncpa [#allocation8], 0  ;;  %s3104_s25 = smov 0  }
   0x6 LB: > { %3603 = sst [smem:[#allocation12_spill]] %s3020_s25  ;;  %s3022_s26 = smov [#allocation4]   ;;  %s3020_s25 = sphi %s3104_s25, %s26_s25  }
   0x7   : > { %s382_s27 = sshll.u32 %s3022_s26, 4  ;;  %s3110_s28 = sadd.s32 4294967295, %s3020_s25   ;;  %s3115_s27 = int_to_ptr.vmem [resolvable:$true] %s382_s27 }
   0x8   : > { %p2193_p0 = scmp.ge.s32.totalorder %s3020_s25, 1  ;;  %p335_p1 = scmp.lt.s32.totalorder %s3020_s25, 3 }
   0x9   : > { %p3599_p2 = scmp.eq.s32.totalorder %s3110_s28, 0  ;;  %s3023_s30 = smov [#allocation2]  }
   0xa   : > { %p3117_p3 = pnand %p2193_p0, %p335_p1  ;;  %s369_s14 = sshll.u32 %s3023_s30, 4  ;;  %s3123_s14 = int_to_ptr.vmem [resolvable:$true] %s369_s14 }
   0xb   : > { %s3024_s16 = smov [#allocation6]   ;;  %s3025_s18 = smov [#allocation7]  }
   0xc   : > { %s3604_s29 = scalar_select %p3117_p3, 1, 0 }
   0xd   : > { %p2844_p4 = pneg %p3117_p3  ;;  %s395_s17 = sshll.u32 %s3024_s16, 4  ;;  %s3131_s17 = int_to_ptr.vmem [resolvable:$true] %s395_s17 }
   0xe   : > { %s3133_s19 = sshll.u32 %s3025_s18, 4  ;;  %s2890_s22 = scalar_lea.hbm %s3594_s10, 3072  ;;  %s410_s19 = int_to_ptr.vmem [resolvable:$true] %s3133_s19 }
   0xf   : > { %p3127_p5 = pnand %p3599_p2, %p2844_p4  ;;  %p2891_p6 = scmp.ne.s32.totalorder %s3594_s10, %s2890_s22 }
  0x10   : > { %p2897_p10 = scmp.lt.u32.totalorder %s2890_s22, %s3594_s10 }
  0x11   : > { %p3143_p7 = pneg %p3127_p5 }
  0x13   : > { %p2893_p8 = pnand %p3143_p7, %p2891_p6 }
  0x15   : > { %p2894_p9 = pneg %p2893_p8 }
  0x17   : > { %p2899_p11 = pnand %p2897_p10, %p2894_p9 }
  0x19   : > { %2902 = shalt.err (!%p2899_p11)
}
  0x1a   : > { %s2903_s18 = scalar_lea.vmem %s3115_s27, 3072  ;;  %p2911_p1 = scmp.lt.s32.totalorder %s3115_s27, %s3115_s27 }
  0x1b   : > { %p2904_p12 = scmp.ne.s32.totalorder %s3115_s27, %s2903_s18  ;;  %p2912_p4 = scmp.lt.s32.totalorder %s2903_s18, %s2903_s18 }
  0x1d   : > { %p2906_p13 = pnand %p2904_p12, %p3143_p7  ;;  %p2913_p6 = por %p2912_p4, %p2911_p1 }
  0x1f   : > { %p2907_p0 = pneg %p2906_p13 }
  0x21   : > { %p2914_p8 = pnand %p2913_p6, %p2907_p0 }
  0x23   : > { %2917 = shalt.err (!%p2914_p8)
}
  0x24   : > { %s3026_s20 = smov 128   ;;  %s3027_s21 = smov 8  }
  0x25   : > { %2850 = dma.hbm_to_vmem [thread:$0]  (!%p3127_p5), %s3594_s10, 3072, %s3115_s27, [#allocation5], %s3026_s20, %s3026_s20, %s3027_s21  }
  0x26   : > { %s2918_s16 = scalar_lea.hbm %s3592_s8, 16 }
  0x27   : > { %p2919_p9 = scmp.ne.s32.totalorder %s3592_s8, %s2918_s16  ;;  %p2925_p12 = scmp.lt.u32.totalorder %s2918_s16, %s3592_s8 }
  0x29   : > { %p2921_p10 = pnand %p2919_p9, %p3143_p7 }
  0x2b   : > { %p2922_p11 = pneg %p2921_p10 }
  0x2d   : > { %p2927_p13 = pnand %p2925_p12, %p2922_p11 }
  0x2f   : > { %2930 = shalt.err (!%p2927_p13)
}
  0x30   : > { %s2931_s27 = scalar_lea.vmem %s3123_s14, 16  ;;  %s2938_s25 = scalar_lea.vmem %s3123_s14, 32 }
  0x31   : > { %p2932_p0 = scmp.ne.s32.totalorder %s3123_s14, %s2931_s27  ;;  %p2939_p6 = scmp.lt.s32.totalorder %s3123_s14, %s3123_s14 }
  0x32   : > { %p2940_p8 = scmp.lt.s32.totalorder %s2938_s25, %s2931_s27 }
  0x33   : > { %p2934_p1 = pnand %p2932_p0, %p3143_p7 }
  0x34   : > { %p2941_p9 = por %p2940_p8, %p2939_p6 }
  0x35   : > { %p2935_p4 = pneg %p2934_p1 }
  0x37   : > { %p2942_p10 = pnand %p2941_p9, %p2935_p4 }
  0x39   : > { %2945 = shalt.err (!%p2942_p10)
}
  0x3a   : > { %2847 = dma.hbm_to_vmem [thread:$0]  (!%p3127_p5), %s3592_s8, 16, %s3123_s14, [#allocation3]  }
  0x3b   : > { %s2946_s24 = scalar_lea.hbm %s3595_s11, 256 }
  0x3c   : > { %p2947_p11 = scmp.ne.s32.totalorder %s3595_s11, %s2946_s24  ;;  %p2953_p0 = scmp.lt.u32.totalorder %s2946_s24, %s3595_s11 }
  0x3e   : > { %p2949_p12 = pnand %p2947_p11, %p3143_p7 }
  0x40   : > { %p2950_p13 = pneg %p2949_p12 }
  0x42   : > { %p2955_p1 = pnand %p2953_p0, %p2950_p13 }
  0x44   : > { %2958 = shalt.err (!%p2955_p1)
}
  0x45   : > { %s2959_s14 = scalar_lea.vmem %s3131_s17, 256  ;;  %p2967_p9 = scmp.lt.s32.totalorder %s3131_s17, %s3131_s17 }
  0x46   : > { %p2960_p4 = scmp.ne.s32.totalorder %s3131_s17, %s2959_s14  ;;  %p2968_p10 = scmp.lt.s32.totalorder %s2959_s14, %s2959_s14 }
  0x48   : > { %p2962_p6 = pnand %p2960_p4, %p3143_p7  ;;  %p2969_p11 = por %p2968_p10, %p2967_p9 }
  0x4a   : > { %p2963_p8 = pneg %p2962_p6 }
  0x4c   : > { %p2970_p12 = pnand %p2969_p11, %p2963_p8 }
  0x4e   : > { %2973 = shalt.err (!%p2970_p12)
}
  0x4f   : > { %2853 = dma.hbm_to_vmem [thread:$0]  (!%p3127_p5), %s3595_s11, 256, %s3131_s17, [#allocation5], %s3026_s20, %s3026_s20, %s3027_s21  }
  0x50   : > { %s2974_s23 = scalar_lea.hbm %s3596_s12, 16 }
  0x51   : > { %p2975_p13 = scmp.ne.s32.totalorder %s3596_s12, %s2974_s23  ;;  %p2981_p4 = scmp.lt.u32.totalorder %s2974_s23, %s3596_s12 }
  0x53   : > { %p2977_p0 = pnand %p2975_p13, %p3143_p7 }
  0x55   : > { %p2978_p1 = pneg %p2977_p0 }
  0x57   : > { %p2983_p6 = pnand %p2981_p4, %p2978_p1 }
  0x59   : > { %2986 = shalt.err (!%p2983_p6)
}
  0x5a   : > { %s2987_s27 = scalar_lea.vmem %s410_s19, 16  ;;  %s2994_s17 = scalar_lea.vmem %s410_s19, 32 }
  0x5b   : > { %p2988_p8 = scmp.ne.s32.totalorder %s410_s19, %s2987_s27  ;;  %p2995_p11 = scmp.lt.s32.totalorder %s410_s19, %s410_s19 }
  0x5c   : > { %p2996_p12 = scmp.lt.s32.totalorder %s2994_s17, %s2987_s27 }
  0x5d   : > { %p2990_p9 = pnand %p2988_p8, %p3143_p7 }
  0x5e   : > { %p2997_p2 = por %p2996_p12, %p2995_p11 }
  0x5f   : > { %p2991_p10 = pneg %p2990_p9 }
  0x61   : > { %p2998_p3 = pnand %p2997_p2, %p2991_p10 }
  0x63   : > { %3001 = shalt.err (!%p2998_p3)
}
  0x64   : > { %2856 = dma.hbm_to_vmem [thread:$0]  (!%p3127_p5), %s3596_s12, 16, %s410_s19, [#allocation8]  }
  0x65   : > { %p3607_p13 = scmp.ne.s32.totalorder %s3604_s29, 0 }
  0x66   : > { %p3608_p0 = scmp.eq.s32.totalorder (!%p3607_p13), %s3110_s28, 0 }
  0x67   : > { %430 = sbr.rel (%p3607_p13) target bundleno = 1986 (0x7c2), region = 72 }
  0x6e   : > { %3007 = dma.done.wait (%p3608_p0), [#allocation3], 16   ;;  %p3609_p7 = pmov %p3608_p0 }
  0x6f   : > { %p3610_p1 = pmov %p3608_p0 }
  0x70   : > { %3009 = vsyncadd (%p3609_p7), [#allocation3], 4294967280 }
  0x71   : > { %3011 = dma.done.wait (%p3610_p1), [#allocation5], 3328   ;;  %p3611_p2 = pmov %p3608_p0 }
  0x72   : > { %p3612_p3 = pmov %p3608_p0 }
  0x73   : > { %3013 = vsyncadd (%p3611_p2), [#allocation5], 4294963968 }
  0x74   : > { %3015 = dma.done.wait (%p3612_p3), [#allocation8], 16   ;;  %p3613_p5 = pmov %p3608_p0 }
  0x75   : > { %p485_p4 = scmp.lt.s32.totalorder %s3110_s28, 1  ;;  %vm498_vm0 = vcmask 1046528   ;;  %v516_v4 = vld [vmem:[%s3585_s1] sm:$0xff]  ;;  %vm518_vm1 = vcmask 121856   ;;  %v604_v9 = vld [vmem:[%s3586_s2 + $0x8] sm:$0xff]  ;;  %v605_v12 = vld [vmem:[%s3586_s2 + $0x10] sm:$0xff] }
  0x76   : > { %3017 = vsyncadd (%p3613_p5), [#allocation8], 4294967280  ;;  %2409 = vmatprep.mubr.msk.f32.mxu0 %vm518_vm1, %v516_v4  ;;  %v603_v8 = vld [vmem:[%s3586_s2] sm:$0xff]  ;;  %v606_v13 = vld [vmem:[%s3586_s2 + $0x18] sm:$0xff]  ;;  %s3028_s20 = smov 124   ;;  %vm630_vm2 = vcmask 1043456  }
  0x77   : > { %s3622_s28 = smov (!%p485_p4, %s3110_s28), 1  ;;  %v2659_v11 = vpack.c.bf16 %v604_v9, %v603_v8  ;;  %v2663_v14 = vpack.c.bf16 %v606_v13, %v605_v12  ;;  %v607_v15 = vld [vmem:[%s3586_s2 + $0x20] sm:$0xff]  ;;  %v608_v16 = vld [vmem:[%s3586_s2 + $0x28] sm:$0xff]  ;;  %v609_v18 = vld [vmem:[%s3586_s2 + $0x30] sm:$0xff]  ;;  %vm3029_vm3 = vmmov 1   ;;  %vm625_vm6 = vcmask 490496  }
  0x78   : > { %s2289_s29 = sshll.u32 %s3622_s28, 4  ;;  %v2667_v17 = vpack.c.bf16 %v608_v16, %v607_v15  ;;  %v610_v19 = vld [vmem:[%s3586_s2 + $0x38] sm:$0xf]  ;;  %vm3288_vm4 = vmpackc.low %vm630_vm2, %vm3029_vm3  ;;  %v2210_v25 = vld [vmem:[%s3586_s2 + $0x40] sm:$0xff]  ;;  %vm800_vm7 = vcmask 1045504   ;;  %v3030_v62 = vmov 0.0|0.0  }
  0x79   : > { %s489_s26 = scalar_lea.vmem %s3584_s0, %s2289_s29  ;;  %2660 = vmatprep.subr.bf16.mxu1 %v2659_v11  ;;  %v2671_v20 = vpack.c.bf16 %v610_v19, %v609_v18  ;;  %v2211_v26 = vld [vmem:[%s3586_s2 + $0x48] sm:$0xff]  ;;  %vm3304_vm5 = vmpackc.low %vm498_vm0, %vm3029_vm3  ;;  %v2212_v32 = vld [vmem:[%s3586_s2 + $0x50] sm:$0xff]  ;;  %vm3031_vm8 = vmmov 0   ;;  %v3032_v63 = vmov 0.0   ;;  %vm889_vm9 = vcmask 97280   ;;  %s3033_s18 = smov 64  }
  0x7a   : > { %v494_v0 = vld [vmem:[%s489_s26] sm:$0xff]  ;;  %v495_v1 = vld [vmem:[%s489_s26 + $0x8] sm:$0xff]  ;;  %2662 = vmatpush3.bf16.msra.mxu1 %v2659_v11  ;;  %v2641_v31 = vpack.c.bf16 %v2211_v26, %v2210_v25  ;;  %v2213_v33 = vld [vmem:[%s3586_s2 + $0x58] sm:$0xff]  ;;  %vm1426_vm10 = vcmask 1041408   ;;  %vm1422_vm12 = vcmask 80896   ;;  %vm1045_vm13 = vcmask 523264  }
  0x7b   : > { %v499_v2 = vrot.slane %v494_v0, 1  ;;  %v500_v3 = vrot.slane %v495_v1, 1  ;;  %2664 = vmatprep.subr.bf16.mxu1 %v2663_v14  ;;  %v517_v34 = vld [vmem:[%s3585_s1 + $0x8] sm:$0x3f]  ;;  %v2645_v35 = vpack.c.bf16 %v2213_v33, %v2212_v32  ;;  %v2214_v36 = vld [vmem:[%s3586_s2 + $0x60] sm:$0xff]  ;;  %v2216_v39 = vld [vmem:[%s3586_s2 + $0x70] sm:$0xff] }
  0x7c   : > { %v2215_v37 = vld [vmem:[%s3586_s2 + $0x68] sm:$0xff]  ;;  %v2217_v40 = vld [vmem:[%s3586_s2 + $0x78] sm:$0xf]  ;;  %v2224_v41 = vld [vmem:[%s3586_s2 + $0x80] sm:$0xff]  ;;  %s3618_s29 = sld [smem:[#allocation13_spill]]  ;;  %vm1933_vm14 = vcmask 64512  }
  0x7d   : > { %v501_v5 = vsel %vm498_vm0, %v499_v2, %v500_v3  ;;  %v505_v6 = vmax.f32 %v495_v1, %v500_v3  ;;  %v2649_v38 = vpack.c.bf16 %v2215_v37, %v2214_v36  ;;  %v2653_v42 = vpack.c.bf16 %v2217_v40, %v2216_v39  ;;  %v2225_v43 = vld [vmem:[%s3586_s2 + $0x88] sm:$0xff]  ;;  %v2226_v45 = vld [vmem:[%s3586_s2 + $0x90] sm:$0xff]  ;;  %v2227_v46 = vld [vmem:[%s3586_s2 + $0x98] sm:$0xff]  ;;  %s2206_s15 = sshll.u32 %s3622_s28, 3  ;;  %s3619_s14 = sld [smem:[#allocation14_spill]] }
  0x7e   : > { %v504_v7 = vmax.f32 %v494_v0, %v501_v5  ;;  %2666 = vmatpush3.bf16.msra.mxu1 %v2663_v14  ;;  %v2677_v44 = vpack.c.bf16 %v2225_v43, %v2224_v41  ;;  %v2681_v53 = vpack.c.bf16 %v2227_v46, %v2226_v45  ;;  %v2228_v54 = vld [vmem:[%s3586_s2 + $0xa0] sm:$0xff]  ;;  %v2229_v55 = vld [vmem:[%s3586_s2 + $0xa8] sm:$0xff]  ;;  %v2230_v59 = vld [vmem:[%s3586_s2 + $0xb0] sm:$0xff] }
  0x7f   : > { %2668 = vmatprep.subr.bf16.mxu1 %v2667_v17  ;;  %v2685_v58 = vpack.c.bf16 %v2229_v55, %v2228_v54  ;;  %v2231_v60 = vld [vmem:[%s3586_s2 + $0xb8] sm:$0xf]  ;;  %v2244_v8 = vld [vmem:[%s3590_s6 + $0x40] sm:$0xff]  ;;  %v2245_v9 = vld [vmem:[%s3590_s6 + $0x48] sm:$0xff] }
  0x80   : > { %v2885_v10 = vpack.i.bf16 %v505_v6, %v504_v7  ;;  %v2689_v61 = vpack.c.bf16 %v2231_v60, %v2230_v59  ;;  %v1056_v11 = vld [vmem:[%s3589_s5] sm:$0xff]  ;;  %v2709_v12 = vpack.c.bf16 %v2245_v9, %v2244_v8  ;;  %v1057_v13 = vld [vmem:[%s3589_s5 + $0x8] sm:$0xf]  ;;  %v2246_v14 = vld [vmem:[%s3590_s6 + $0x50] sm:$0xff] }
  0x81   : > { %v2247_v15 = vld [vmem:[%s3590_s6 + $0x58] sm:$0xff]  ;;  %v2249_v18 = vld [vmem:[%s3590_s6 + $0x68] sm:$0xff]  ;;  %v1141_v37 = vld [vmem:[%s3590_s6 + $0x10] sm:$0xff] }
  0x82   : > { %2886 = vrot.lane.b32.xlu0 %v2885_v10, %s3028_s20  ;;  %2670 = vmatpush3.bf16.msra.mxu1 %v2667_v17  ;;  %v2237_v10 = vld [vmem:[%s3587_s3 + $0x8] sm:$0xff]  ;;  %v2713_v16 = vpack.c.bf16 %v2247_v15, %v2246_v14  ;;  %v2248_v17 = vld [vmem:[%s3590_s6 + $0x60] sm:$0xff]  ;;  %v2261_v54 = vld [vmem:[%s3590_s6 + $0x98] sm:$0xff] }
  0x83   : > { %2673 = vmatprep.subr.msk.bf16.mxu1 %vm3288_vm4, %v2671_v20  ;;  %v2717_v19 = vpack.c.bf16 %v2249_v18, %v2248_v17  ;;  %v1140_v25 = vld [vmem:[%s3590_s6 + $0x8] sm:$0xff]  ;;  %v2264_v59 = vld [vmem:[%s3590_s6 + $0xb0] sm:$0xff]  ;;  %v2265_v60 = vld [vmem:[%s3590_s6 + $0xb8] sm:$0xf]  ;;  %s493_s25 = scalar_lea.vmem %s3619_s14, %s2206_s15 }
  0x84   : > { %v1144_v45 = vld [vmem:[%s3590_s6 + $0x28] sm:$0xff]  ;;  %vm2765_vm11 = vmpackc.low %vm1426_vm10, %vm3029_vm3  ;;  %v1684_v29 = vld [vmem:[#allocation4 + $0x58] sm:$0xff] }
  0x85   : > { %v1590_v8 = vld [vmem:[%s3593_s9 + $0x8] sm:$0x3]  ;;  %v1687_v14 = vld [vmem:[#allocation4 + $0x70] sm:$0xff]  ;;  %v1688_v15 = vld [vmem:[#allocation4 + $0x78] sm:$0xf] }
  0x86   : > { %2676 = vmatpush3.bf16.msk.msra.mxu1 %vm3288_vm4, %v2671_v20  ;;  %v2250_v20 = vld [vmem:[%s3590_s6 + $0x70] sm:$0xff] }
  0x87   : > { %2678 = vmatprep.subr.bf16.mxu1 %v2677_v44 }
  0xf4   : > { %v2887_v22 = vpop.permute.xlu0 %2886 }
  0xf5   : > { %v2889_v23 = vunpack.i.h.bf16 %v2887_v22  ;;  %v2888_v24 = vunpack.i.l.bf16 %v2887_v22  ;;  %v2251_v22 = vld [vmem:[%s3590_s6 + $0x78] sm:$0xf] }
  0xf7   : > { %v515_v27 = vmax.f32 %v505_v6, %v2889_v23  ;;  %v514_v28 = vmax.f32 %v504_v7, %v2888_v24  ;;  %v888_v7 = vld [vmem:[%s3587_s3] sm:$0xff]  ;;  %v2721_v23 = vpack.c.bf16 %v2251_v22, %v2250_v20 }
  0xf8   : > { %v1139_v24 = vld [vmem:[%s3590_s6] sm:$0xff] }
  0xf9   : > { %v3308_v30 = vpack.c.bf16 %v515_v27, %v514_v28  ;;  %v2727_v26 = vpack.c.bf16 %v1140_v25, %v1139_v24  ;;  %v1672_v22 = vld [vmem:[#allocation4] sm:$0xff] }
  0xfb   : > { %2637 = vmatprep.subr.msk.bf16.mxu0 %vm3304_vm5, %v3308_v30 }
  0xfc   : > { %2640 = vmatpush3.bf16.msk.msra.mxu0 %vm3304_vm5, %v3308_v30 }
  0xfd   : > { %2642 = vmatprep.subr.bf16.mxu0 %v2641_v31 }
  0xff   : > { %2410 = vmatmul.mubr.msk.f32.vlgmr.msra.gmra.mrb[0].mxu0 %vm518_vm1, %v517_v34 }
 0x100   : > { %2644 = vmatpush3.bf16.msra.mxu0 %v2641_v31 }
 0x101   : > { %2646 = vmatprep.subr.bf16.mxu0 %v2645_v35 }
 0x104   : > { %2648 = vmatpush3.bf16.msra.mxu0 %v2645_v35 }
 0x105   : > { %2650 = vmatprep.subr.bf16.mxu0 %v2649_v38 }
 0x108   : > { %2652 = vmatpush3.bf16.msra.mxu0 %v2649_v38  ;;  %v1142_v38 = vld [vmem:[%s3590_s6 + $0x18] sm:$0xff] }
 0x109   : > { %2655 = vmatprep.subr.msk.bf16.mxu0 %vm3288_vm4, %v2653_v42 }
 0x10c   : > { %2658 = vmatpush3.bf16.msk.msra.mxu0 %vm3288_vm4, %v2653_v42  ;;  %v2731_v42 = vpack.c.bf16 %v1142_v38, %v1141_v37 }
 0x10d   : > { %2695 = vmatprep.subr.bf16.mxu0 %v3030_v62 }
 0x1d2   : > { %v2411_v47 = vpop.f32.mrb[0].mxu0 }
 0x1d3   : > { %v623_v48 = vrot.slane %v2411_v47, 1  ;;  %v802_v49 = vrot.slane %v2411_v47, 2  ;;  %v594_v50 = vpop.f32.mrb[1].mxu0 }
 0x1d4   : > { %v622_v51 = vrot.slane %v594_v50, 1  ;;  %v801_v52 = vrot.slane %v594_v50, 2  ;;  %2447 = vmatprep.mubr.msk.f32.mxu1 %vm625_vm6, %v594_v50  ;;  %v2258_v50 = vld [vmem:[%s3590_s6 + $0x80] sm:$0xff] }
 0x1d5   : > { %2448 = vmatmul.mubr.msk.f32.vlgmr.msra.gmra.mrb[0].mxu1 %vm625_vm6, %v2411_v47  ;;  %v1145_v47 = vld [vmem:[%s3590_s6 + $0x30] sm:$0xff] }
 0x1d6   : > { %2680 = vmatpush3.bf16.msra.mxu1 %v2677_v44  ;;  %v624_v56 = vsel %vm498_vm0, %v622_v51, %v623_v48  ;;  %v803_v57 = vsel %vm800_vm7, %v801_v52, %v802_v49  ;;  %v1143_v44 = vld [vmem:[%s3590_s6 + $0x20] sm:$0xff]  ;;  %v2259_v51 = vld [vmem:[%s3590_s6 + $0x88] sm:$0xff] }
 0x1d7   : > { %2428 = vmatprep.mubr.msk.f32.mxu0 %vm625_vm6, %v624_v56  ;;  %2466 = vmatprep.mubr.msk.f32.mxu1 %vm625_vm6, %v803_v57  ;;  %v2735_v46 = vpack.c.bf16 %v1144_v45, %v1143_v44  ;;  %v2745_v52 = vpack.c.bf16 %v2259_v51, %v2258_v50  ;;  %v2262_v56 = vld [vmem:[%s3590_s6 + $0xa0] sm:$0xff]  ;;  %v2263_v57 = vld [vmem:[%s3590_s6 + $0xa8] sm:$0xff] }
 0x1d8   : > { %2429 = vmatmul.mubr.msk.f32.vlgmr.msra.gmra.mrb[2].mxu0 %vm625_vm6, %v623_v48  ;;  %2682 = vmatprep.subr.bf16.mxu1 %v2681_v53  ;;  %v1146_v48 = vld [vmem:[%s3590_s6 + $0x38] sm:$0xf]  ;;  %v1845_v45 = vld [vmem:[#allocation4 + $0x80] sm:$0xff] }
 0x1d9   : > { %2473 = vmatprep.mubr.msk.f32.mxu0 %vm3031_vm8, %v3032_v63  ;;  %v1849_v51 = vld [vmem:[#allocation4 + $0xa0] sm:$0xff] }
 0x1da   : > { %2684 = vmatpush3.bf16.msra.mxu1 %v2681_v53  ;;  %v2260_v53 = vld [vmem:[%s3590_s6 + $0x90] sm:$0xff] }
 0x1db   : > { %2686 = vmatprep.subr.bf16.mxu1 %v2685_v58  ;;  %v2749_v55 = vpack.c.bf16 %v2261_v54, %v2260_v53  ;;  %v1851_v54 = vld [vmem:[#allocation4 + $0xb0] sm:$0xff] }
 0x1de   : > { %2688 = vmatpush3.bf16.msra.mxu1 %v2685_v58  ;;  %v2753_v58 = vpack.c.bf16 %v2263_v57, %v2262_v56 }
 0x1df   : > { %2691 = vmatprep.subr.msk.bf16.mxu1 %vm3288_vm4, %v2689_v61 }
 0x1e2   : > { %2694 = vmatpush3.bf16.msk.msra.mxu1 %vm3288_vm4, %v2689_v61  ;;  %v2757_v61 = vpack.c.bf16 %v2265_v60, %v2264_v59 }
 0x1e3   : > { %2763 = vmatprep.subr.bf16.mxu1 %v3030_v62 }
 0x1e5   : > { %2467 = vmatmul.mubr.msk.f32.vlgmr.msra.gmra.mrb[0].mxu1 %vm625_vm6, %v802_v49  ;;  %v2739_v49 = vpack.c.bf16 %v1146_v48, %v1145_v47  ;;  %v1847_v48 = vld [vmem:[#allocation4 + $0x90] sm:$0xff] }
 0x1e6   : > { %2551 = vmatprep.mubr.msk.f32.mxu1 %vm3031_vm8, %v3032_v63 }
 0x2ab   : > { %v2430_v0 = vpop.f32.mrb[2].mxu0 }
 0x2ac   : > { %v700_v1 = vpop.f32.mrb[3].mxu0 }
 0x2b8   : > { %v2468_v2 = vpop.f32.mrb[0].mxu1 }
 0x2b9   : > { %v2816_v3 = vadd.f32 %v2468_v2, %v2430_v0  ;;  %v877_v4 = vpop.f32.mrb[1].mxu1 }
 0x2ba   : > { %v2817_v5 = vadd.f32 %v877_v4, %v700_v1  ;;  %v2271_v4 = vld [vmem:[%s3591_s7 + $0x8] sm:$0xff] }
 0x2bc   : > { %v2696_v6 = vpack.c.bf16 %v2816_v3, %v2817_v5  ;;  %v1421_v3 = vld [vmem:[%s3591_s7] sm:$0xff] }
 0x2bd   : > { %v1589_v5 = vld [vmem:[%s3593_s9] sm:$0xff] }
 0x2be   : > { %2698 = vmatpush3.bf16.msk.msra.mxu0 %vm3288_vm4, %v2696_v6 }
 0x2bf   : > { %2699 = vmatprep.subr.bf16.mxu0 %v3030_v62 }
 0x2c1   : > { %2474 = vmatmul.mubr.msk.f32.vlgmr.msra.gmra.mrb[4].mxu0 %vm889_vm9, %v888_v7  ;;  %v1682_v7 = vld [vmem:[#allocation4 + $0x48] sm:$0xff] }
 0x2c2   : > { %2702 = vmatpush3.bf16.msk.msra.mxu0 %vm3288_vm4, %v2696_v6  ;;  %2480 = vmatprep.mubr.msk.f32.mxu0 %vm3031_vm8, %v3032_v63  ;;  %v1681_v6 = vld [vmem:[#allocation4 + $0x40] sm:$0xff] }
 0x2c3   : > { %2705 = vmatprep.subr.msk.bf16.mxu0 %vm3304_vm5, %v3308_v30  ;;  %v2778_v9 = vpack.c.bf16 %v1682_v7, %v1681_v6  ;;  %v2274_v7 = vld [vmem:[#allocation2] ss:$0 sm:$0xff] }
 0x2c5   : > { %2481 = vmatmul.mubr.msk.f32.vlgmr.msra.gmra.mrb[6].mxu0 %vm889_vm9, %v2237_v10  ;;  %v1683_v10 = vld [vmem:[#allocation4 + $0x50] sm:$0xff] }
 0x2c6   : > { %2708 = vmatpush3.bf16.msk.msra.mxu0 %vm3304_vm5, %v3308_v30  ;;  %2487 = vmatprep.mubr.msk.f32.mxu0 %vm518_vm1, %v1056_v11  ;;  %v1685_v11 = vld [vmem:[#allocation4 + $0x60] sm:$0xff] }
 0x2c7   : > { %2710 = vmatprep.subr.bf16.mxu0 %v2709_v12 }
 0x2c9   : > { %2488 = vmatmul.mubr.msk.f32.vlgmr.msra.gmra.mrb[8].mxu0 %vm518_vm1, %v1057_v13 }
 0x2ca   : > { %2712 = vmatpush3.bf16.msra.mxu0 %v2709_v12  ;;  %v1686_v12 = vld [vmem:[#allocation4 + $0x68] sm:$0xff] }
 0x2cb   : > { %2714 = vmatprep.subr.bf16.mxu0 %v2713_v16  ;;  %v2784_v13 = vpack.c.bf16 %v1686_v12, %v1685_v11 }
 0x2ce   : > { %2716 = vmatpush3.bf16.msra.mxu0 %v2713_v16  ;;  %v2787_v16 = vpack.c.bf16 %v1688_v15, %v1687_v14 }
 0x2cf   : > { %2718 = vmatprep.subr.bf16.mxu0 %v2717_v19 }
 0x2d2   : > { %2720 = vmatpush3.bf16.msra.mxu0 %v2717_v19 }
 0x2d3   : > { %2723 = vmatprep.subr.msk.bf16.mxu0 %vm3288_vm4, %v2721_v23 }
 0x2d6   : > { %2726 = vmatpush3.bf16.msk.msra.mxu0 %vm3288_vm4, %v2721_v23  ;;  %v1673_v23 = vld [vmem:[#allocation4 + $0x8] sm:$0xff] }
 0x2d7   : > { %2728 = vmatprep.subr.bf16.mxu0 %v2727_v26 }
 0x394   : > { %v3445_v27 = vpop.f32.mrb[4].mxu0 }
 0x395   : > { %v2475_v28 = vpop.f32.mrb[5].mxu0 }
 0x398   : > { %v1037_v31 = vpop.f32.mrb[6].mxu0 }
 0x399   : > { %1042 = vrot.lane.b32.xlu0 %v1037_v31, %s3033_s18  ;;  %v2482_v32 = vpop.f32.mrb[7].mxu0 }
 0x39c   : > { %v2489_v33 = vpop.f32.mrb[8].mxu0 }
 0x39d   : > { %v1159_v34 = vrot.slane %v2489_v33, 1  ;;  %v1335_v35 = vrot.slane %v2489_v33, 2  ;;  %v1130_v36 = vpop.f32.mrb[9].mxu0 }
 0x39e   : > { %v1158_v39 = vrot.slane %v1130_v36, 1  ;;  %v1334_v40 = vrot.slane %v1130_v36, 2 }
 0x3a0   : > { %v1160_v41 = vsel %vm498_vm0, %v1158_v39, %v1159_v34  ;;  %v1336_v43 = vsel %vm800_vm7, %v1334_v40, %v1335_v35  ;;  %v1676_v39 = vld [vmem:[#allocation4 + $0x20] sm:$0xff]  ;;  %v1677_v40 = vld [vmem:[#allocation4 + $0x28] sm:$0xff] }
 0x3a1   : > { %2506 = vmatprep.mubr.msk.f32.mxu0 %vm625_vm6, %v1160_v41  ;;  %v2797_v41 = vpack.c.bf16 %v1677_v40, %v1676_v39 }
 0x3a2   : > { %2507 = vmatmul.mubr.msk.f32.vlgmr.msra.gmra.mrb[10].mxu0 %vm625_vm6, %v1159_v34  ;;  %v1674_v34 = vld [vmem:[#allocation4 + $0x10] sm:$0xff] }
 0x3a3   : > { %2730 = vmatpush3.bf16.msra.mxu0 %v2727_v26  ;;  %2525 = vmatprep.mubr.msk.f32.mxu0 %vm625_vm6, %v1130_v36 }
 0x3a4   : > { %2732 = vmatprep.subr.bf16.mxu0 %v2731_v42 }
 0x3a7   : > { %2734 = vmatpush3.bf16.msra.mxu0 %v2731_v42  ;;  %v1678_v42 = vld [vmem:[#allocation4 + $0x30] sm:$0xff] }
 0x3a8   : > { %2736 = vmatprep.subr.bf16.mxu0 %v2735_v46 }
 0x3ab   : > { %2738 = vmatpush3.bf16.msra.mxu0 %v2735_v46  ;;  %v1846_v46 = vld [vmem:[#allocation4 + $0x88] sm:$0xff] }
 0x3ac   : > { %2741 = vmatprep.subr.msk.bf16.mxu0 %vm3288_vm4, %v2739_v49  ;;  %v2804_v47 = vpack.c.bf16 %v1846_v46, %v1845_v45 }
 0x3af   : > { %2744 = vmatpush3.bf16.msk.msra.mxu0 %vm3288_vm4, %v2739_v49  ;;  %v1848_v49 = vld [vmem:[#allocation4 + $0x98] sm:$0xff] }
 0x3b0   : > { %2746 = vmatprep.subr.bf16.mxu0 %v2745_v52  ;;  %v2807_v50 = vpack.c.bf16 %v1848_v49, %v1847_v48 }
 0x3b2   : > { %2526 = vmatmul.mubr.msk.f32.vlgmr.msra.gmra.mrb[10].mxu0 %vm625_vm6, %v2489_v33  ;;  %v2791_v33 = vpack.c.bf16 %v1673_v23, %v1672_v22 }
 0x3b3   : > { %2748 = vmatpush3.bf16.msra.mxu0 %v2745_v52  ;;  %2544 = vmatprep.mubr.msk.f32.mxu0 %vm625_vm6, %v1336_v43  ;;  %v1679_v43 = vld [vmem:[#allocation4 + $0x38] sm:$0xf]  ;;  %v1850_v52 = vld [vmem:[#allocation4 + $0xa8] sm:$0xff] }
 0x3b4   : > { %2750 = vmatprep.subr.bf16.mxu0 %v2749_v55  ;;  %v2800_v44 = vpack.c.bf16 %v1679_v43, %v1678_v42  ;;  %v2810_v53 = vpack.c.bf16 %v1850_v52, %v1849_v51 }
 0x3b7   : > { %2752 = vmatpush3.bf16.msra.mxu0 %v2749_v55  ;;  %v1852_v55 = vld [vmem:[#allocation4 + $0xb8] sm:$0xf] }
 0x3b8   : > { %2754 = vmatprep.subr.bf16.mxu0 %v2753_v58  ;;  %v2813_v56 = vpack.c.bf16 %v1852_v55, %v1851_v54 }
 0x3bb   : > { %2756 = vmatpush3.bf16.msra.mxu0 %v2753_v58  ;;  %v2240_v58 = vld [vmem:[%s3618_s29] ss:$0 sm:$0xff] }
 0x3bc   : > { %2759 = vmatprep.subr.msk.bf16.mxu0 %vm3288_vm4, %v2757_v61 }
 0x3bf   : > { %2762 = vmatpush3.bf16.msk.msra.mxu0 %vm3288_vm4, %v2757_v61 }
 0x3c0   : > { %2625 = vmatprep.subr.mxu0 %v3032_v63 }
 0x3c2   : > { %2545 = vmatmul.mubr.msk.f32.vlgmr.msra.gmra.mrb[10].mxu0 %vm625_vm6, %v1335_v35  ;;  %v1675_v35 = vld [vmem:[#allocation4 + $0x18] sm:$0xff] }
 0x3c3   : > { %2627 = vmatprep.mubr.msk.f32.mxu0 %vm3031_vm8, %v3032_v63  ;;  %v2794_v38 = vpack.c.bf16 %v1675_v35, %v1674_v34 }
 0x40b   : > { %v1043_v57 = vpop.permute.xlu0 %1042 }
 0x40c   : > { %v1046_v59 = vsel %vm1045_vm13, %v3445_v27, %v1043_v57  ;;  %v2008_v27 = vld [vmem:[#allocation6 + $0x8] sm:$0xff] }
 0x40d   : > { %v1055_v60 = vadd.f32 %v2240_v58, %v1046_v59 }
 0x495   : > { %v2546_v0 = vpop.f32.mrb[10].mxu0 }
 0x496   : > { %v1410_v1 = vpop.f32.mrb[11].mxu0 }
 0x497   : > { %v2764_v2 = vpack.c.bf16 %v2546_v0, %v1410_v1  ;;  %v1932_v1 = vld [vmem:[#allocation6] sm:$0xff] }
 0x499   : > { %2766 = vmatpush3.bf16.msk.msra.mxu1 %vm2765_vm11, %v2764_v2 }
 0x49a   : > { %2767 = vmatprep.subr.bf16.mxu1 %v3030_v62 }
 0x49c   : > { %2552 = vmatmul.mubr.msk.f32.vlgmr.msra.gmra.mrb[2].mxu1 %vm1422_vm12, %v1421_v3 }
 0x49d   : > { %2770 = vmatpush3.bf16.msk.msra.mxu1 %vm2765_vm11, %v2764_v2  ;;  %2558 = vmatprep.mubr.msk.f32.mxu1 %vm3031_vm8, %v3032_v63 }
 0x49e   : > { %2773 = vmatprep.subr.msk.bf16.mxu1 %vm3304_vm5, %v3308_v30 }
 0x4a0   : > { %2559 = vmatmul.mubr.msk.f32.vlgmr.msra.gmra.mrb[4].mxu1 %vm1422_vm12, %v2271_v4 }
 0x4a1   : > { %2776 = vmatpush3.bf16.msk.msra.mxu1 %vm3304_vm5, %v3308_v30  ;;  %2565 = vmatprep.mubr.msk.f32.mxu1 %vm518_vm1, %v1589_v5  ;;  %v2781_v30 = vpack.c.bf16 %v1684_v29, %v1683_v10  ;;  %v2286_v10 = vld [vmem:[#allocation7] ss:$0 sm:$0xff] }
 0x4a2   : > { %2777 = vmatprep.subr.bf16.mxu1 %v3030_v62 }
 0x4a4   : > { %2566 = vmatmul.mubr.msk.f32.vlgmr.msra.gmra.mrb[6].mxu1 %vm518_vm1, %v1590_v8 }
 0x4a5   : > { %2779 = vmatpush3.bf16.msra.mxu1 %v2778_v9  ;;  %2584 = vmatprep.mubr.msk.f32.mxu1 %vm3031_vm8, %v3032_v63 }
 0x4a6   : > { %2780 = vmatprep.subr.bf16.mxu1 %v3030_v62 }
 0x4a9   : > { %2782 = vmatpush3.bf16.msra.mxu1 %v2781_v30 }
 0x4aa   : > { %2783 = vmatprep.subr.bf16.mxu1 %v3030_v62 }
 0x4ad   : > { %2785 = vmatpush3.bf16.msra.mxu1 %v2784_v13 }
 0x4ae   : > { %2786 = vmatprep.subr.bf16.mxu1 %v3030_v62 }
 0x4b1   : > { %2789 = vmatpush3.bf16.msk.msra.mxu1 %vm3288_vm4, %v2787_v16 }
 0x4b2   : > { %2790 = vmatprep.subr.bf16.mxu1 %v3030_v62 }
 0x56f   : > { %v3542_v17 = vpop.f32.mrb[2].mxu1 }
 0x570   : > { %v2553_v18 = vpop.f32.mrb[3].mxu1 }
 0x573   : > { %v1571_v19 = vpop.f32.mrb[4].mxu1 }
 0x574   : > { %1576 = vrot.lane.b32.xlu1 %v1571_v19, %s3033_s18  ;;  %v2560_v20 = vpop.f32.mrb[5].mxu1 }
 0x577   : > { %v2567_v24 = vpop.f32.mrb[6].mxu1 }
 0x578   : > { %v1692_v25 = vrot.slane %v2567_v24, 1  ;;  %v1854_v26 = vrot.slane %v2567_v24, 2  ;;  %v1663_v28 = vpop.f32.mrb[7].mxu1 }
 0x579   : > { %v1691_v31 = vrot.slane %v1663_v28, 1  ;;  %v1853_v32 = vrot.slane %v1663_v28, 2 }
 0x57b   : > { %v1693_v36 = vsel %vm498_vm0, %v1691_v31, %v1692_v25  ;;  %v1855_v37 = vsel %vm800_vm7, %v1853_v32, %v1854_v26 }
 0x57c   : > { %2585 = vmatmul.mubr.msk.f32.vlgmr.msra.gmra.mrb[8].mxu1 %vm625_vm6, %v1693_v36 }
 0x57d   : > { %2792 = vmatpush3.bf16.msra.mxu1 %v2791_v33  ;;  %2603 = vmatprep.mubr.msk.f32.mxu1 %vm3031_vm8, %v3032_v63 }
 0x57e   : > { %2793 = vmatprep.subr.bf16.mxu1 %v3030_v62 }
 0x581   : > { %2795 = vmatpush3.bf16.msra.mxu1 %v2794_v38 }
 0x582   : > { %2796 = vmatprep.subr.bf16.mxu1 %v3030_v62 }
 0x585   : > { %2798 = vmatpush3.bf16.msra.mxu1 %v2797_v41 }
 0x586   : > { %2799 = vmatprep.subr.bf16.mxu1 %v3030_v62 }
 0x589   : > { %2802 = vmatpush3.bf16.msk.msra.mxu1 %vm3288_vm4, %v2800_v44 }
 0x58a   : > { %2803 = vmatprep.subr.bf16.mxu1 %v3030_v62 }
 0x58c   : > { %2604 = vmatmul.mubr.msk.f32.vlgmr.msra.gmra.mrb[8].mxu1 %vm625_vm6, %v1663_v28 }
 0x58d   : > { %2805 = vmatpush3.bf16.msra.mxu1 %v2804_v47  ;;  %2622 = vmatprep.mubr.msk.f32.mxu1 %vm3031_vm8, %v3032_v63 }
 0x58e   : > { %2806 = vmatprep.subr.bf16.mxu1 %v3030_v62 }
 0x591   : > { %2808 = vmatpush3.bf16.msra.mxu1 %v2807_v50 }
 0x592   : > { %2809 = vmatprep.subr.bf16.mxu1 %v3030_v62 }
 0x595   : > { %2811 = vmatpush3.bf16.msra.mxu1 %v2810_v53 }
 0x596   : > { %2812 = vmatprep.subr.bf16.mxu1 %v3030_v62 }
 0x599   : > { %2815 = vmatpush3.bf16.msk.msra.mxu1 %vm3288_vm4, %v2813_v56 }
 0x59c   : > { %2623 = vmatmul.mubr.msk.f32.vlgmr.msra.gmra.mrb[8].mxu1 %vm625_vm6, %v1855_v37 }
 0x5e6   : > { %v1577_v61 = vpop.permute.xlu1 %1576 }
 0x5e7   : > { %v1579_v0 = vsel %vm1045_vm13, %v3542_v17, %v1577_v61 }
 0x5e8   : > { %v1580_v62 = vadd.f32 %v1579_v0, %v1055_v60 }
 0x5ea   : > { %v1588_v8 = vadd.f32 %v2274_v7, %v1580_v62 }
 0x66f   : > { %v1927_v21 = vpop.f32.mrb[8].mxu1 }
 0x670   : > { %v2624_v2 = vpop.f32.mrb[9].mxu1  ;;  %2626 = vmatpush3.msra.mxu0 %v1927_v21 }
 0x671   : > { %2628 = vmatmul.mubr.msk.f32.vlgmr.msra.gmra.mrb[12].mxu0 %vm1933_vm14, %v1932_v1  ;;  %2630 = vmatprep.subr.mxu0 %v3032_v63 }
 0x672   : > { %2631 = vmatpush3.msra.mxu0 %v1927_v21  ;;  %2632 = vmatprep.mubr.msk.f32.mxu0 %vm3031_vm8, %v3032_v63 }
 0x675   : > { %2633 = vmatmul.mubr.msk.f32.vlgmr.msra.gmra.mrb[14].mxu0 %vm1933_vm14, %v2008_v27 }
 0x744   : > { %v2003_v3 = vpop.f32.mrb[12].mxu0 }
 0x745   : > { %v2629_v4 = vpop.f32.mrb[13].mxu0 }
 0x748   : > { %v2078_v5 = vpop.f32.mrb[14].mxu0 }
 0x749   : > { %2083 = vrot.lane.b32.xlu1 %v2078_v5, %s3033_s18  ;;  %v2634_v6 = vpop.f32.mrb[15].mxu0 }
 0x7bb   : > { %v2084_v9 = vpop.permute.xlu1 %2083 }
 0x7bc   : > { %v2086_v29 = vsel %vm1045_vm13, %v2003_v3, %v2084_v9 }
 0x7bd   : > { %v2087_v30 = vadd.f32 %v2086_v29, %v1588_v8 }
 0x7bf   : > { %v2095_v63 = vadd.f32 %v2286_v10, %v2087_v30 }
 0x7c1   : > { %2096 = vst [vmem:[%s493_s25] sm:$0xff] %v2095_v63 }
 0x7c2 PF: > { %s3620_s4 = sld [smem:[#allocation12_spill]] }
 0x7c8   : > { %s26_s25 = sadd.s32 1, %s3620_s4  }
 0x7c9   : > { %p23_p6 = scmp.ge.s32.totalorder %s26_s25, 4  }
 0x7cb   :  { %25 = sbr.rel (!%p23_p6) target bundleno = 6 (0x6), region = 128 }
 0x7d2   :  { %2116 = vsyncpa [#allocation3], 1 }
 0x7d3   :  { %2118 = vsyncpa [#allocation3 + $0x1], 1 }
 0x7d4   :  { %2119 = vsyncpa [#allocation5], 1 }
 0x7d5   :  { %2120 = vsyncpa [#allocation8], 1 }

</bundles_post_ra>
